<compile_context>
chip_gen: v7x
topology: tpu7x:2x2x1
jax: 0.10.0
libtpu: 0.0.40
codegen_flags: <defaults>
</compile_context>

<pallas_src>
import functools

import jax
import jax.numpy as jnp
from jax.experimental import pallas as pl
from jax.experimental.pallas import tpu as pltpu


def _round_up(x, m):
    return ((x + m - 1) // m) * m


def _pick_tb(B):
    """Batch tile: >=4 grid blocks when possible (v7x megacore), rows mult. of 16."""
    if B <= 32:
        return _round_up(B, 16)
    tb = _round_up(-(-B // 4), 16)       # ceil(B/4) rounded to the bf16 sublane tile
    return max(16, min(tb, 2048))        # cap: stays far under scoped-VMEM everywhere


def _autoencoder_kernel(x_ref, wg_ref, bg_ref, wf_ref, bf_ref, wh_ref, bh_ref, o_ref):
    # x streams as f32 (tb, N); cast to bf16 in-register for the MXU.
    x = x_ref[...].astype(wg_ref.dtype)
    # Layer g: (tb, N) @ (N, K_pad) -> f32 acc, bias + sigmoid in f32.
    h1 = jnp.dot(x, wg_ref[...], preferred_element_type=jnp.float32)
    h1 = jax.nn.sigmoid(h1 + bg_ref[...])
    # Layer f: (tb, K_pad) @ (K_pad, K_pad). Padded lanes of h1 are sigmoid(0)=0.5 but
    # the corresponding rows of Wf are zero, so they contribute nothing.
    h2 = jnp.dot(h1.astype(wf_ref.dtype), wf_ref[...],
                 preferred_element_type=jnp.float32)
    h2 = jax.nn.sigmoid(h2 + bf_ref[...])
    # Layer h: (tb, K_pad) @ (K_pad, N)  (no final sigmoid, mtype='default').
    out = jnp.dot(h2.astype(wh_ref.dtype), wh_ref[...],
                  preferred_element_type=jnp.float32)
    o_ref[...] = (out + bh_ref[...]).astype(o_ref.dtype)


def prepare_params(wg, bg, wf, bf, wh, bh, compute_dtype=jnp.bfloat16):
    """One-time pad (k -> multiple of 128 lanes) + bf16 cast of the weights.

    Weights are (in_features, out_features) (i.e. transposed vs torch nn.Linear.weight),
    biases are (1, out_features). Call once; the padded params are reused every forward.
    """
    N, K = wg.shape
    k_pad = _round_up(K, 128)

    def pad2(a, rows, cols, dtype):
        if a.shape == (rows, cols) and a.dtype == dtype:
            return a.astype(dtype)
        return jnp.zeros((rows, cols), dtype).at[: a.shape[0], : a.shape[1]].set(
            a.astype(dtype))

    wgp = pad2(wg, N, k_pad, compute_dtype)        # (N, K_pad)
    wfp = pad2(wf, k_pad, k_pad, compute_dtype)    # (K_pad, K_pad), zero padded rows
    whp = pad2(wh, k_pad, N, compute_dtype)        # (K_pad, N),     zero padded rows
    bgp = pad2(bg, 1, k_pad, jnp.float32)
    bfp = pad2(bf, 1, k_pad, jnp.float32)
    bhp = pad2(bh, 1, N, jnp.float32)
    return wgp, bgp, wfp, bfp, whp, bhp


@functools.partial(jax.jit, static_argnames=("tb",))
def autoencoder_forward(x, wgp, bgp, wfp, bfp, whp, bhp, *, tb=None):
    """Fused 3-layer autoencoder forward.

    x: (B, num_question) f32.  Weights/biases must come from prepare_params().
    Returns (B, num_question) f32.
    """
    B, N = x.shape
    k_pad = wgp.shape[1]

    if tb is None:
        tb = _pick_tb(B)
    b_pad = _round_up(B, tb)

    # Only pad batch rows when B doesn't divide into tiles (usually a no-op).
    xp = x if b_pad == B else jnp.zeros((b_pad, N), x.dtype).at[:B].set(x)

    grid = (b_pad // tb,)
    w_bytes = (N * k_pad + k_pad * k_pad + k_pad * N) * jnp.dtype(wgp.dtype).itemsize
    flops = 2 * b_pad * (N * k_pad + k_pad * k_pad + k_pad * N)
    bytes_accessed = b_pad * N * 4 + w_bytes + b_pad * N * 4   # x in + weights + out

    out = pl.pallas_call(
        _autoencoder_kernel,
        out_shape=jax.ShapeDtypeStruct((b_pad, N), jnp.float32),
        grid=grid,
        in_specs=[
            pl.BlockSpec((tb, N), lambda i: (i, 0)),        # x tile (streams, f32)
            pl.BlockSpec((N, k_pad), lambda i: (0, 0)),     # Wg (VMEM-resident)
            pl.BlockSpec((1, k_pad), lambda i: (0, 0)),     # bg
            pl.BlockSpec((k_pad, k_pad), lambda i: (0, 0)),  # Wf
            pl.BlockSpec((1, k_pad), lambda i: (0, 0)),     # bf
            pl.BlockSpec((k_pad, N), lambda i: (0, 0)),     # Wh
            pl.BlockSpec((1, N), lambda i: (0, 0)),         # bh
        ],
        out_specs=pl.BlockSpec((tb, N), lambda i: (i, 0)),
        compiler_params=pltpu.CompilerParams(
            dimension_semantics=("parallel",)),
        cost_estimate=pl.CostEstimate(
            flops=flops,
            transcendentals=2 * b_pad * k_pad,              # two sigmoid layers
            bytes_accessed=bytes_accessed),
    )(xp, wgp, bgp, wfp, bfp, whp, bhp)

    return out if b_pad == B else out[:B]


def init_params(key, num_question, k):
    """PyTorch nn.Linear-style init (uniform +-1/sqrt(fan_in)), stored (in, out)."""
    ks = jax.random.split(key, 6)

    def lin(kw, kb, fan_in, fan_out):
        bound = 1.0 / jnp.sqrt(fan_in)
        w = jax.random.uniform(kw, (fan_in, fan_out), jnp.float32, -bound, bound)
        b = jax.random.uniform(kb, (1, fan_out), jnp.float32, -bound, bound)
        return w, b

    wg, bg = lin(ks[0], ks[1], num_question, k)
    wf, bf = lin(ks[2], ks[3], k, k)
    wh, bh = lin(ks[4], ks[5], k, num_question)
    return wg, bg, wf, bf, wh, bh


def reference_forward(x, wg, bg, wf, bf, wh, bh, compute_dtype=jnp.float32):
    """Pure-JAX reference with the same operand dtype / f32 accumulation."""
    cd = compute_dtype
    h1 = jax.nn.sigmoid(
        jnp.dot(x.astype(cd), wg.astype(cd), preferred_element_type=jnp.float32) + bg)
    h2 = jax.nn.sigmoid(
        jnp.dot(h1.astype(cd), wf.astype(cd), preferred_element_type=jnp.float32) + bf)
    return jnp.dot(h2.astype(cd), wh.astype(cd),
                   preferred_element_type=jnp.float32) + bh


# TODO(synk): the mtype='one-hot' preprocessing branch (torch one_hot + cat) is not
# implemented; only the default 3-layer dense path is translated.

if __name__ == "__main__":
    # Small AutoEncoder shapes: 512 users, num_question=64, k=32 (grid of 4 tiles).
    B, NQ, K = 512, 64, 32
    key = jax.random.PRNGKey(0)
    kx, kp = jax.random.split(key)

    # Synthetic user vectors (0/1 answered-correct pattern).
    x = (jax.random.uniform(kx, (B, NQ)) > 0.5).astype(jnp.float32)
    params = init_params(kp, NQ, K)

    # One-time weight pad + bf16 cast (kept out of the per-call path).
    prepared = jax.block_until_ready(prepare_params(*params))

    out = jax.block_until_ready(autoencoder_forward(x, *prepared))
    assert out.shape == (B, NQ)
    assert out.dtype == jnp.float32

    # Exact-semantics check vs a reference using the same bf16 operands / f32 accumulation.
    ref_bf16 = reference_forward(x, *params, compute_dtype=jnp.bfloat16)
    assert jnp.allclose(out, ref_bf16, atol=2e-3, rtol=2e-3), "mismatch vs bf16 reference"

    # Sanity check vs the full-f32 reference (bf16 weight quantization -> loose tol).
    ref_f32 = reference_forward(x, *params, compute_dtype=jnp.float32)
    assert jnp.allclose(out, ref_f32, atol=1e-1, rtol=1e-1), "mismatch vs f32 reference"

    print("KERNEL_OK")
</pallas_src>

<mosaic_0001>
module attributes {stable_mosaic.version = 11 : i64} {
  func.func @_autoencoder_kernel(%arg0: i32, %arg1: memref<128x64xf32, #tpu.memory_space<vmem>>, %arg2: memref<64x128xbf16, #tpu.memory_space<vmem>>, %arg3: memref<1x128xf32, #tpu.memory_space<vmem>>, %arg4: memref<128x128xbf16, #tpu.memory_space<vmem>>, %arg5: memref<1x128xf32, #tpu.memory_space<vmem>>, %arg6: memref<128x64xbf16, #tpu.memory_space<vmem>>, %arg7: memref<1x64xf32, #tpu.memory_space<vmem>>, %arg8: memref<128x64xf32, #tpu.memory_space<vmem>>) attributes {dimension_semantics = [#tpu.dimension_semantics<parallel>], iteration_bounds = array<i64: 4>, scalar_prefetch = 0 : i64, scratch_operands = 0 : i64, tpu.core_type = #tpu.core_type<tc>, window_params = [{transform_indices = @transform_0, window_bounds = array<i64: 128, 64>}, {pipeline_mode = #tpu.pipeline_mode<synchronous>, transform_indices = @transform_1, window_bounds = array<i64: 64, 128>}, {pipeline_mode = #tpu.pipeline_mode<synchronous>, transform_indices = @transform_2, window_bounds = array<i64: 1, 128>}, {pipeline_mode = #tpu.pipeline_mode<synchronous>, transform_indices = @transform_3, window_bounds = array<i64: 128, 128>}, {pipeline_mode = #tpu.pipeline_mode<synchronous>, transform_indices = @transform_4, window_bounds = array<i64: 1, 128>}, {pipeline_mode = #tpu.pipeline_mode<synchronous>, transform_indices = @transform_5, window_bounds = array<i64: 128, 64>}, {pipeline_mode = #tpu.pipeline_mode<synchronous>, transform_indices = @transform_6, window_bounds = array<i64: 1, 64>}, {transform_indices = @transform_7, window_bounds = array<i64: 128, 64>}]} {
    %c0 = arith.constant 0 : index
    %c0_0 = arith.constant 0 : index
    %0 = vector.load %arg1[%c0, %c0_0] : memref<128x64xf32, #tpu.memory_space<vmem>>, vector<128x64xf32>
    %1 = arith.truncf %0 : vector<128x64xf32> to vector<128x64xbf16>
    %c0_1 = arith.constant 0 : index
    %c0_2 = arith.constant 0 : index
    %2 = vector.load %arg2[%c0_1, %c0_2] : memref<64x128xbf16, #tpu.memory_space<vmem>>, vector<64x128xbf16>
    %cst = arith.constant dense<0.000000e+00> : vector<128x128xf32>
    %3 = tpu.matmul %1, %2, %cst {dimension_numbers = #tpu.dot_dimension_numbers<[1], [0], [0], [1], [0, 0, 1, 1], [], []>} : vector<128x64xbf16>, vector<64x128xbf16>, vector<128x128xf32> -> vector<128x128xf32>
    %c0_3 = arith.constant 0 : index
    %c0_4 = arith.constant 0 : index
    %4 = vector.load %arg3[%c0_3, %c0_4] : memref<1x128xf32, #tpu.memory_space<vmem>>, vector<1x128xf32>
    %5 = vector.broadcast %4 : vector<1x128xf32> to vector<128x128xf32>
    %6 = arith.addf %3, %5 : vector<128x128xf32>
    %7 = arith.negf %6 : vector<128x128xf32>
    %8 = math.exp %7 : vector<128x128xf32>
    %cst_5 = arith.constant 1.000000e+00 : f32
    %9 = vector.broadcast %cst_5 : f32 to vector<128x128xf32>
    %10 = arith.addf %9, %8 : vector<128x128xf32>
    %11 = arith.divf %9, %10 : vector<128x128xf32>
    %12 = arith.truncf %11 : vector<128x128xf32> to vector<128x128xbf16>
    %c0_6 = arith.constant 0 : index
    %c0_7 = arith.constant 0 : index
    %13 = vector.load %arg4[%c0_6, %c0_7] : memref<128x128xbf16, #tpu.memory_space<vmem>>, vector<128x128xbf16>
    %cst_8 = arith.constant dense<0.000000e+00> : vector<128x128xf32>
    %14 = tpu.matmul %12, %13, %cst_8 {dimension_numbers = #tpu.dot_dimension_numbers<[1], [0], [0], [1], [0, 0, 1, 1], [], []>} : vector<128x128xbf16>, vector<128x128xbf16>, vector<128x128xf32> -> vector<128x128xf32>
    %c0_9 = arith.constant 0 : index
    %c0_10 = arith.constant 0 : index
    %15 = vector.load %arg5[%c0_9, %c0_10] : memref<1x128xf32, #tpu.memory_space<vmem>>, vector<1x128xf32>
    %16 = vector.broadcast %15 : vector<1x128xf32> to vector<128x128xf32>
    %17 = arith.addf %14, %16 : vector<128x128xf32>
    %18 = arith.negf %17 : vector<128x128xf32>
    %19 = math.exp %18 : vector<128x128xf32>
    %cst_11 = arith.constant 1.000000e+00 : f32
    %20 = vector.broadcast %cst_11 : f32 to vector<128x128xf32>
    %21 = arith.addf %20, %19 : vector<128x128xf32>
    %22 = arith.divf %20, %21 : vector<128x128xf32>
    %23 = arith.truncf %22 : vector<128x128xf32> to vector<128x128xbf16>
    %c0_12 = arith.constant 0 : index
    %c0_13 = arith.constant 0 : index
    %24 = vector.load %arg6[%c0_12, %c0_13] : memref<128x64xbf16, #tpu.memory_space<vmem>>, vector<128x64xbf16>
    %cst_14 = arith.constant dense<0.000000e+00> : vector<128x64xf32>
    %25 = tpu.matmul %23, %24, %cst_14 {dimension_numbers = #tpu.dot_dimension_numbers<[1], [0], [0], [1], [0, 0, 1, 1], [], []>} : vector<128x128xbf16>, vector<128x64xbf16>, vector<128x64xf32> -> vector<128x64xf32>
    %c0_15 = arith.constant 0 : index
    %c0_16 = arith.constant 0 : index
    %26 = vector.load %arg7[%c0_15, %c0_16] : memref<1x64xf32, #tpu.memory_space<vmem>>, vector<1x64xf32>
    %27 = vector.broadcast %26 : vector<1x64xf32> to vector<128x64xf32>
    %28 = arith.addf %25, %27 : vector<128x64xf32>
    %c0_17 = arith.constant 0 : index
    %c0_18 = arith.constant 0 : index
    %29 = vector.load %arg8[%c0_17, %c0_18] : memref<128x64xf32, #tpu.memory_space<vmem>>, vector<128x64xf32>
    tpu.vector_store %arg8[%c0_17, %c0_18], %28 {strides = array<i32>} : memref<128x64xf32, #tpu.memory_space<vmem>>, vector<128x64xf32>,
    return
  }
  func.func @transform_0(%arg0: i32) -> (i32, i32) {
    %c0_i32 = arith.constant 0 : i32
    %c0_i32_0 = arith.constant 0 : i32
    return %arg0, %c0_i32 : i32, i32
  }
  func.func @transform_1(%arg0: i32) -> (i32, i32) {
    %c0_i32 = arith.constant 0 : i32
    %c0_i32_0 = arith.constant 0 : i32
    %c0_i32_1 = arith.constant 0 : i32
    return %c0_i32, %c0_i32_0 : i32, i32
  }
  func.func @transform_2(%arg0: i32) -> (i32, i32) {
    %c0_i32 = arith.constant 0 : i32
    %c0_i32_0 = arith.constant 0 : i32
    %c0_i32_1 = arith.constant 0 : i32
    return %c0_i32, %c0_i32_0 : i32, i32
  }
  func.func @transform_3(%arg0: i32) -> (i32, i32) {
    %c0_i32 = arith.constant 0 : i32
    %c0_i32_0 = arith.constant 0 : i32
    %c0_i32_1 = arith.constant 0 : i32
    return %c0_i32, %c0_i32_0 : i32, i32
  }
  func.func @transform_4(%arg0: i32) -> (i32, i32) {
    %c0_i32 = arith.constant 0 : i32
    %c0_i32_0 = arith.constant 0 : i32
    %c0_i32_1 = arith.constant 0 : i32
    return %c0_i32, %c0_i32_0 : i32, i32
  }
  func.func @transform_5(%arg0: i32) -> (i32, i32) {
    %c0_i32 = arith.constant 0 : i32
    %c0_i32_0 = arith.constant 0 : i32
    %c0_i32_1 = arith.constant 0 : i32
    return %c0_i32, %c0_i32_0 : i32, i32
  }
  func.func @transform_6(%arg0: i32) -> (i32, i32) {
    %c0_i32 = arith.constant 0 : i32
    %c0_i32_0 = arith.constant 0 : i32
    %c0_i32_1 = arith.constant 0 : i32
    return %c0_i32, %c0_i32_0 : i32, i32
  }
  func.func @transform_7(%arg0: i32) -> (i32, i32) {
    %c0_i32 = arith.constant 0 : i32
    %c0_i32_0 = arith.constant 0 : i32
    return %arg0, %c0_i32 : i32, i32
  }
}

</mosaic_0001>

<bundles_post_ra>
// kernel: autoencoder_forward.1
= control target key start
LH: loop header
LB: loop body
LE: loop exit
PB: predicated region body
PF: predicated region fallthrough
CT: control target
= control target key end

     0   :  { %s1510_s24 = smov 0   ;;  %s1699_s0 = inlined_call_operand.vmem [shape: f32[512,64], index: 0, kind: input, shape index: {}]   ;;  %s1700_s1 = inlined_call_operand.vmem [shape: bf16[64,128], index: 1, kind: input, shape index: {}]   ;;  %s1701_s2 = inlined_call_operand.vmem [shape: f32[1,128], index: 2, kind: input, shape index: {}]   ;;  %s1702_s3 = inlined_call_operand.vmem [shape: bf16[128,128], index: 3, kind: input, shape index: {}]   ;;  %s1703_s4 = inlined_call_operand.vmem [shape: f32[1,128], index: 4, kind: input, shape index: {}]   ;;  %s1704_s5 = inlined_call_operand.vmem [shape: bf16[128,64], index: 5, kind: input, shape index: {}]   ;;  %s1705_s6 = inlined_call_operand.vmem [shape: f32[1,64], index: 6, kind: input, shape index: {}]   ;;  %s1706_s7 = inlined_call_operand.vmem [shape: f32[512,64], index: 7, kind: output, shape index: {}]  }
   0x1 LB: > { %s1084_s25 = sadd.s32 4294967295, %s1468_s24   ;;  %p1088_p0 = scmp.ge.s32.totalorder %s1468_s24, 1  ;;  %s1468_s24 = sphi %s1510_s24, %s17_s24  }
   0x2   : > { %p238_p1 = scmp.lt.s32.totalorder %s1468_s24, 5 }
   0x4   : > { %p239_p2 = pnand %p1088_p0, %p238_p1 }
   0x5   : > { %v1314_v0 = vld [vmem:[%s1700_s1] sm:$0xff] (!%p239_p2)   ;;  %s1089_s28 = sshll.u32 (!%p239_p2), %s1084_s25, 4  ;;  %v1315_v1 = vld [vmem:[%s1700_s1 + $0x8] sm:$0xff] (!%p239_p2)   ;;  %v1316_v2 = vld [vmem:[%s1700_s1 + $0x10] sm:$0xff] (!%p239_p2)   ;;  %vm346_vm0 = vcmask (!%p239_p2), 523264  }
   0x6   : > { %242 = sbr.rel (%p239_p2) target bundleno = 757 (0x2f5), region = 48  ;;  %p271_p3 = scmp.lt.s32.totalorder (!%p239_p2), %s1089_s28, 63  ;;  %1202 = vmatprep.subr.bf16.mxu0 (!%p239_p2), %v1314_v0  ;;  %v1317_v5 = vld [vmem:[%s1700_s1 + $0x18] sm:$0xff] (!%p239_p2)   ;;  %v1318_v28 = vld [vmem:[%s1702_s3] sm:$0xff] (!%p239_p2)   ;;  %v1319_v29 = vld [vmem:[%s1702_s3 + $0x8] sm:$0xff] (!%p239_p2)  }
   0x7   : > { %1203 = vmatpush3.bf16.msra.mxu0 (!%p239_p2), %v1314_v0  ;;  %1226 = vmatprep.subr.bf16.mxu1 (!%p239_p2), %v1318_v28  ;;  %v1320_v30 = vld [vmem:[%s1702_s3 + $0x10] sm:$0xff] (!%p239_p2)   ;;  %v1321_v31 = vld [vmem:[%s1702_s3 + $0x18] sm:$0xff] (!%p239_p2)   ;;  %v1322_v32 = vld [vmem:[%s1702_s3 + $0x20] sm:$0xff] (!%p239_p2)  }
   0x8   : > { %1204 = vmatprep.subr.bf16.mxu0 (!%p239_p2), %v1315_v1  ;;  %1227 = vmatpush3.bf16.msra.mxu1 (!%p239_p2), %v1318_v28  ;;  %v1323_v33 = vld [vmem:[%s1702_s3 + $0x28] sm:$0xff] (!%p239_p2)   ;;  %v1324_v34 = vld [vmem:[%s1702_s3 + $0x30] sm:$0xff] (!%p239_p2)   ;;  %v1325_v35 = vld [vmem:[%s1702_s3 + $0x38] sm:$0xff] (!%p239_p2)  }
   0x9   : > { %1228 = vmatprep.subr.bf16.mxu1 (!%p239_p2), %v1319_v29  ;;  %v1591_v36 = vld [vmem:[%s1701_s2] ss:$0 sm:$0xff] (!%p239_p2) }
   0xb   : > { %1205 = vmatpush3.bf16.msra.mxu0 (!%p239_p2), %v1315_v1 }
   0xc   : > { %1206 = vmatprep.subr.bf16.mxu0 (!%p239_p2), %v1316_v2  ;;  %1229 = vmatpush3.bf16.msra.mxu1 (!%p239_p2), %v1319_v29 }
   0xd   : > { %s1708_s28 = smov (!%p271_p3, %s1089_s28), 63  ;;  %1230 = vmatprep.subr.bf16.mxu1 %v1320_v30 }
   0xe   : > { %s1090_s10 = sshll.u32 %s1708_s28, 3 }
   0xf   : > { %s1535_s13 = scalar_lea.vmem %s1699_s0, %s1090_s10  ;;  %1207 = vmatpush3.bf16.msra.mxu0 %v1316_v2  ;;  %s1662_s16 = scalar_lea.vmem %s1706_s7, %s1090_s10 }
  0x10   : > { %v283_v3 = vld [vmem:[%s1535_s13] sm:$0xff]  ;;  %v284_v4 = vld [vmem:[%s1535_s13 + $0x8] sm:$0xff]  ;;  %v285_v7 = vld [vmem:[%s1535_s13 + $0x10] sm:$0xff]  ;;  %1208 = vmatprep.subr.bf16.mxu0 %v1317_v5  ;;  %1231 = vmatpush3.bf16.msra.mxu1 %v1320_v30 }
  0x11   : > { %v299_v6 = vpack.c.bf16 %v284_v4, %v283_v3  ;;  %v286_v8 = vld [vmem:[%s1535_s13 + $0x18] sm:$0xff]  ;;  %v287_v9 = vld [vmem:[%s1535_s13 + $0x20] sm:$0xff]  ;;  %v288_v10 = vld [vmem:[%s1535_s13 + $0x28] sm:$0xff]  ;;  %1232 = vmatprep.subr.bf16.mxu1 %v1321_v31 }
  0x12   : > { %v300_v11 = vpack.c.bf16 %v286_v8, %v285_v7  ;;  %v301_v12 = vpack.c.bf16 %v288_v10, %v287_v9  ;;  %v289_v13 = vld [vmem:[%s1535_s13 + $0x30] sm:$0xff]  ;;  %v290_v14 = vld [vmem:[%s1535_s13 + $0x38] sm:$0xff]  ;;  %v291_v15 = vld [vmem:[%s1535_s13 + $0x40] sm:$0xff] }
  0x13   : > { %1210 = vmatprep.mubr.msk.bf16.mxu0 %vm346_vm0, %v299_v6  ;;  %1209 = vmatpush3.bf16.msra.mxu0 %v1317_v5  ;;  %v292_v16 = vld [vmem:[%s1535_s13 + $0x48] sm:$0xff]  ;;  %v302_v17 = vpack.c.bf16 %v290_v14, %v289_v13  ;;  %v293_v19 = vld [vmem:[%s1535_s13 + $0x50] sm:$0xff]  ;;  %v294_v20 = vld [vmem:[%s1535_s13 + $0x58] sm:$0xff] }
  0x14   : > { %v303_v18 = vpack.c.bf16 %v292_v16, %v291_v15  ;;  %v295_v21 = vld [vmem:[%s1535_s13 + $0x60] sm:$0xff]  ;;  %v296_v22 = vld [vmem:[%s1535_s13 + $0x68] sm:$0xff]  ;;  %v304_v23 = vpack.c.bf16 %v294_v20, %v293_v19  ;;  %v297_v25 = vld [vmem:[%s1535_s13 + $0x70] sm:$0xff]  ;;  %1233 = vmatpush3.bf16.msra.mxu1 %v1321_v31 }
  0x15   : > { %v305_v24 = vpack.c.bf16 %v296_v22, %v295_v21  ;;  %v298_v26 = vld [vmem:[%s1535_s13 + $0x78] sm:$0xff]  ;;  %1234 = vmatprep.subr.bf16.mxu1 %v1322_v32 }
  0x16   : > { %1211 = vmatmul.mubr.msk.bf16.vlgmr.msra.gmra.mrb[0].mxu0 %vm346_vm0, %v300_v11  ;;  %v306_v27 = vpack.c.bf16 %v298_v26, %v297_v25 }
  0x17   : > { %1214 = vmatprep.mubr.msk.bf16.mxu0 %vm346_vm0, %v301_v12 }
  0x18   : > { %1235 = vmatpush3.bf16.msra.mxu1 %v1322_v32 }
  0x19   : > { %1236 = vmatprep.subr.bf16.mxu1 %v1323_v33 }
  0x1c   : > { %1237 = vmatpush3.bf16.msra.mxu1 %v1323_v33 }
  0x1d   : > { %1238 = vmatprep.subr.bf16.mxu1 %v1324_v34 }
  0x1e   : > { %1215 = vmatmul.mubr.msk.bf16.gmra.mrb[4].mxu0 %vm346_vm0, %v302_v17 }
  0x1f   : > { %1218 = vmatprep.mubr.msk.bf16.mxu0 %vm346_vm0, %v303_v18 }
  0x20   : > { %1239 = vmatpush3.bf16.msra.mxu1 %v1324_v34 }
  0x21   : > { %1240 = vmatprep.subr.bf16.mxu1 %v1325_v35 }
  0x24   : > { %1241 = vmatpush3.bf16.msra.mxu1 %v1325_v35 }
  0x26   : > { %1219 = vmatmul.mubr.msk.bf16.gmra.mrb[8].mxu0 %vm346_vm0, %v304_v23 }
  0x27   : > { %1222 = vmatprep.mubr.msk.bf16.mxu0 %vm346_vm0, %v305_v24 }
  0x2e   : > { %1223 = vmatmul.mubr.msk.bf16.gmra.mrb[12].mxu0 %vm346_vm0, %v306_v27 }
  0xe9   : > { %v1212_v37 = vpop.f32.mrb[0].mxu0 }
  0xea   : > { %v414_v38 = vadd.f32 %v1212_v37, %v1591_v36  ;;  %v405_v39 = vpop.f32.mrb[1].mxu0 }
  0xeb   : > { %v406_v40 = vadd.f32 %v1591_v36, %v405_v39  ;;  %v1213_v41 = vpop.f32.mrb[2].mxu0 }
  0xec   : > { %v1108_v42 = vmul.f32 -1.442695, %v414_v38  ;;  %v417_v43 = vadd.f32 %v1213_v41, %v1591_v36  ;;  %v408_v44 = vpop.f32.mrb[3].mxu0 }
  0xed   : > { %v1106_v45 = vmul.f32 -1.442695, %v406_v40  ;;  %v409_v46 = vadd.f32 %v1591_v36, %v408_v44 }
  0xee   : > { %1334 = vpow2.f32 %v1108_v42  ;;  %v1109_v47 = vmul.f32 -1.442695, %v417_v43 }
  0xef   : > { %1336 = vpow2.f32 %v1106_v45  ;;  %v1107_v48 = vmul.f32 -1.442695, %v409_v46 }
  0xf0   : > { %1338 = vpow2.f32 %v1109_v47 }
  0xf1   : > { %1340 = vpow2.f32 %v1107_v48  ;;  %v1216_v49 = vpop.f32.mrb[4].mxu0 }
  0xf2   : > { %v430_v50 = vadd.f32 %v1216_v49, %v1591_v36  ;;  %v421_v51 = vpop.f32.mrb[5].mxu0 }
  0xf3   : > { %v422_v52 = vadd.f32 %v1591_v36, %v421_v51  ;;  %v1217_v53 = vpop.f32.mrb[6].mxu0 }
  0xf4   : > { %v1112_v54 = vmul.f32 -1.442695, %v430_v50  ;;  %v433_v55 = vadd.f32 %v1217_v53, %v1591_v36  ;;  %v424_v56 = vpop.f32.mrb[7].mxu0 }
  0xf5   : > { %v1110_v57 = vmul.f32 -1.442695, %v422_v52  ;;  %v425_v58 = vadd.f32 %v1591_v36, %v424_v56 }
  0xf6   : > { %1342 = vpow2.f32 %v1112_v54  ;;  %v1113_v59 = vmul.f32 -1.442695, %v433_v55 }
  0xf7   : > { %1344 = vpow2.f32 %v1110_v57  ;;  %v1111_v60 = vmul.f32 -1.442695, %v425_v58 }
  0xf8   : > { %v1335_v61 = vpop.eup %1334  ;;  %1346 = vpow2.f32 %v1113_v59 }
  0xf9   : > { %v1337_v62 = vpop.eup %1336  ;;  %v518_v63 = vadd.f32 1.0, %v1335_v61  ;;  %1348 = vpow2.f32 %v1111_v60  ;;  %v1220_v0 = vpop.f32.mrb[8].mxu0 }
  0xfa   : > { %v1339_v1 = vpop.eup %1338  ;;  %v516_v2 = vadd.f32 1.0, %v1337_v62  ;;  %v446_v3 = vadd.f32 %v1220_v0, %v1591_v36  ;;  %v437_v4 = vpop.f32.mrb[9].mxu0 }
  0xfb   : > { %v1341_v5 = vpop.eup %1340  ;;  %1350 = vrcp.f32 %v518_v63  ;;  %v519_v6 = vadd.f32 1.0, %v1339_v1  ;;  %v438_v7 = vadd.f32 %v1591_v36, %v437_v4  ;;  %v1221_v8 = vpop.f32.mrb[10].mxu0 }
  0xfc   : > { %1352 = vrcp.f32 %v516_v2  ;;  %v517_v9 = vadd.f32 1.0, %v1341_v5  ;;  %v1116_v10 = vmul.f32 -1.442695, %v446_v3  ;;  %v449_v11 = vadd.f32 %v1221_v8, %v1591_v36  ;;  %v440_v12 = vpop.f32.mrb[11].mxu0 }
  0xfd   : > { %1354 = vrcp.f32 %v519_v6  ;;  %v1114_v13 = vmul.f32 -1.442695, %v438_v7  ;;  %v441_v14 = vadd.f32 %v1591_v36, %v440_v12 }
  0xfe   : > { %1356 = vrcp.f32 %v517_v9  ;;  %v1117_v15 = vmul.f32 -1.442695, %v449_v11 }
  0xff   : > { %1358 = vpow2.f32 %v1116_v10  ;;  %v1115_v16 = vmul.f32 -1.442695, %v441_v14  ;;  %v1327_v14 = vld [vmem:[%s1704_s5 + $0x8] sm:$0xff]  }
 0x100   : > { %v1343_v17 = vpop.eup %1342  ;;  %1360 = vpow2.f32 %v1114_v13  ;;  %v1326_v13 = vld [vmem:[%s1704_s5] sm:$0xff]  }
 0x101   : > { %v1345_v18 = vpop.eup %1344  ;;  %v522_v19 = vadd.f32 1.0, %v1343_v17  ;;  %1362 = vpow2.f32 %v1117_v15  ;;  %v1224_v20 = vpop.f32.mrb[12].mxu0  ;;  %1258 = vmatprep.subr.bf16.mxu0 %v1326_v13  ;;  %1290 = vmatprep.subr.bf16.mxu1 %v1326_v13  ;;  %v1328_v15 = vld [vmem:[%s1704_s5 + $0x10] sm:$0xff]   ;;  %v1330_v17 = vld [vmem:[%s1704_s5 + $0x20] sm:$0xff]  }
 0x102   : > { %v1347_v21 = vpop.eup %1346  ;;  %v520_v22 = vadd.f32 1.0, %v1345_v18  ;;  %1364 = vpow2.f32 %v1115_v16  ;;  %v462_v23 = vadd.f32 %v1224_v20, %v1591_v36  ;;  %v453_v24 = vpop.f32.mrb[13].mxu0  ;;  %1259 = vmatpush3.bf16.msra.mxu0 %v1326_v13  ;;  %v1329_v16 = vld [vmem:[%s1704_s5 + $0x18] sm:$0xff]   ;;  %v1331_v18 = vld [vmem:[%s1704_s5 + $0x28] sm:$0xff]  }
 0x103   : > { %v1349_v25 = vpop.eup %1348  ;;  %1366 = vrcp.f32 %v522_v19  ;;  %v523_v26 = vadd.f32 1.0, %v1347_v21  ;;  %v454_v27 = vadd.f32 %v1591_v36, %v453_v24  ;;  %v1225_v28 = vpop.f32.mrb[14].mxu0  ;;  %1260 = vmatprep.subr.bf16.mxu0 %v1327_v14  ;;  %v1332_v19 = vld [vmem:[%s1704_s5 + $0x30] sm:$0xff]   ;;  %v1333_v20 = vld [vmem:[%s1704_s5 + $0x38] sm:$0xff]   ;;  %v1636_v21 = vld [vmem:[%s1703_s4] ss:$0 sm:$0xff] }
 0x104   : > { %1368 = vrcp.f32 %v520_v22  ;;  %v521_v29 = vadd.f32 1.0, %v1349_v25  ;;  %v1120_v30 = vmul.f32 -1.442695, %v462_v23  ;;  %v465_v31 = vadd.f32 %v1225_v28, %v1591_v36  ;;  %v456_v32 = vpop.f32.mrb[15].mxu0 }
 0x105   : > { %v1351_v33 = vpop.eup %1350  ;;  %1370 = vrcp.f32 %v523_v26  ;;  %v1118_v34 = vmul.f32 -1.442695, %v454_v27  ;;  %v457_v35 = vadd.f32 %v1591_v36, %v456_v32 }
 0x106   : > { %v1353_v37 = vpop.eup %1352  ;;  %1372 = vrcp.f32 %v521_v29  ;;  %v1121_v38 = vmul.f32 -1.442695, %v465_v31  ;;  %1261 = vmatpush3.bf16.msra.mxu0 %v1327_v14 }
 0x107   : > { %v1355_v39 = vpop.eup %1354  ;;  %1374 = vpow2.f32 %v1120_v30  ;;  %v1119_v40 = vmul.f32 -1.442695, %v457_v35  ;;  %1262 = vmatprep.subr.bf16.mxu0 %v1328_v15 }
 0x108   : > { %v1357_v41 = vpop.eup %1356  ;;  %1376 = vpow2.f32 %v1118_v34  ;;  %v565_v42 = vpack.c.bf16 %v1355_v39, %v1351_v33 }
 0x109   : > { %v1359_v43 = vpop.eup %1358  ;;  %1378 = vpow2.f32 %v1121_v38  ;;  %v564_v44 = vpack.c.bf16 %v1357_v41, %v1353_v37 }
 0x10a   : > { %v1361_v45 = vpop.eup %1360  ;;  %v526_v46 = vadd.f32 1.0, %v1359_v43  ;;  %1380 = vpow2.f32 %v1119_v40  ;;  %1263 = vmatpush3.bf16.msra.mxu0 %v1328_v15 }
 0x10b   : > { %v1363_v47 = vpop.eup %1362  ;;  %v524_v48 = vadd.f32 1.0, %v1361_v45  ;;  %1242 = vmatprep.mubr.bf16.mxu1 %v564_v44  ;;  %1264 = vmatprep.subr.bf16.mxu0 %v1329_v16 }
 0x10c   : > { %v1365_v49 = vpop.eup %1364  ;;  %1382 = vrcp.f32 %v526_v46  ;;  %v527_v36 = vadd.f32 1.0, %v1363_v47  ;;  %1243 = vmatmul.mubr.bf16.vlgmr.msra.gmra.mrb[0].mxu1 %v565_v42 }
 0x10d   : > { %v1367_v50 = vpop.eup %1366  ;;  %1384 = vrcp.f32 %v524_v48  ;;  %v525_v51 = vadd.f32 1.0, %v1365_v49  ;;  %1298 = vmatpush3.bf16.msra.mxu1 %v1326_v13 }
 0x10e   : > { %v1369_v52 = vpop.eup %1368  ;;  %1386 = vrcp.f32 %v527_v36  ;;  %1291 = vmatprep.subr.bf16.mxu1 %v1327_v14  ;;  %1265 = vmatpush3.bf16.msra.mxu0 %v1329_v16 }
 0x10f   : > { %v1371_v53 = vpop.eup %1370  ;;  %1388 = vrcp.f32 %v525_v51  ;;  %1266 = vmatprep.subr.bf16.mxu0 %v1330_v17 }
 0x110   : > { %v1373_v54 = vpop.eup %1372  ;;  %v567_v55 = vpack.c.bf16 %v1371_v53, %v1367_v50 }
 0x111   : > { %v1375_v56 = vpop.eup %1374  ;;  %v566_v57 = vpack.c.bf16 %v1373_v54, %v1369_v52  ;;  %1299 = vmatpush3.bf16.msra.mxu1 %v1327_v14 }
 0x112   : > { %v1377_v58 = vpop.eup %1376  ;;  %v530_v59 = vadd.f32 1.0, %v1375_v56  ;;  %1292 = vmatprep.subr.bf16.mxu1 %v1328_v15  ;;  %1267 = vmatpush3.bf16.msra.mxu0 %v1330_v17 }
 0x113   : > { %v1379_v60 = vpop.eup %1378  ;;  %v528_v61 = vadd.f32 1.0, %v1377_v58  ;;  %1246 = vmatprep.mubr.bf16.mxu1 %v566_v57  ;;  %1268 = vmatprep.subr.bf16.mxu0 %v1331_v18 }
 0x114   : > { %v1381_v62 = vpop.eup %1380  ;;  %1390 = vrcp.f32 %v530_v59  ;;  %v531_v63 = vadd.f32 1.0, %v1379_v60  ;;  %1247 = vmatmul.mubr.bf16.gmra.mrb[4].mxu1 %v567_v55 }
 0x115   : > { %1392 = vrcp.f32 %v528_v61  ;;  %v529_v0 = vadd.f32 1.0, %v1381_v62  ;;  %1300 = vmatpush3.bf16.msra.mxu1 %v1328_v15 }
 0x116   : > { %v1383_v1 = vpop.eup %1382  ;;  %1394 = vrcp.f32 %v531_v63  ;;  %1293 = vmatprep.subr.bf16.mxu1 %v1329_v16  ;;  %1269 = vmatpush3.bf16.msra.mxu0 %v1331_v18 }
 0x117   : > { %v1385_v2 = vpop.eup %1384  ;;  %1396 = vrcp.f32 %v529_v0  ;;  %1270 = vmatprep.subr.bf16.mxu0 %v1332_v19 }
 0x118   : > { %v1387_v3 = vpop.eup %1386 }
 0x119   : > { %v1389_v4 = vpop.eup %1388  ;;  %v569_v5 = vpack.c.bf16 %v1387_v3, %v1383_v1  ;;  %1301 = vmatpush3.bf16.msra.mxu1 %v1329_v16 }
 0x11a   : > { %v568_v6 = vpack.c.bf16 %v1389_v4, %v1385_v2  ;;  %1294 = vmatprep.subr.bf16.mxu1 %v1330_v17  ;;  %1271 = vmatpush3.bf16.msra.mxu0 %v1332_v19 }
 0x11b   : > { %1272 = vmatprep.subr.bf16.mxu0 %v1333_v20 }
 0x11c   : > { %1250 = vmatprep.mubr.bf16.mxu1 %v568_v6 }
 0x11d   : > { %1251 = vmatmul.mubr.bf16.gmra.mrb[8].mxu1 %v569_v5 }
 0x11e   : > { %v1391_v7 = vpop.eup %1390  ;;  %1302 = vmatpush3.bf16.msra.mxu1 %v1330_v17  ;;  %1273 = vmatpush3.bf16.msra.mxu0 %v1333_v20 }
 0x11f   : > { %v1393_v8 = vpop.eup %1392  ;;  %1295 = vmatprep.subr.bf16.mxu1 %v1331_v18 }
 0x120   : > { %v1395_v9 = vpop.eup %1394 }
 0x121   : > { %v1397_v10 = vpop.eup %1396  ;;  %v571_v11 = vpack.c.bf16 %v1395_v9, %v1391_v7 }
 0x122   : > { %v570_v12 = vpack.c.bf16 %v1397_v10, %v1393_v8  ;;  %1303 = vmatpush3.bf16.msra.mxu1 %v1331_v18 }
 0x123   : > { %1296 = vmatprep.subr.bf16.mxu1 %v1332_v19 }
 0x124   : > { %1254 = vmatprep.mubr.bf16.mxu1 %v570_v12 }
 0x125   : > { %1255 = vmatmul.mubr.bf16.gmra.mrb[12].mxu1 %v571_v11 }
 0x126   : > { %1304 = vmatpush3.bf16.msra.mxu1 %v1332_v19 }
 0x127   : > { %1297 = vmatprep.subr.bf16.mxu1 %v1333_v20 }
 0x12a   : > { %1305 = vmatpush3.bf16.msra.mxu1 %v1333_v20 }
 0x1df   : > { %v1244_v22 = vpop.f32.mrb[0].mxu1 }
 0x1e0   : > { %v686_v23 = vadd.f32 %v1244_v22, %v1636_v21  ;;  %v677_v24 = vpop.f32.mrb[1].mxu1 }
 0x1e1   : > { %v678_v25 = vadd.f32 %v1636_v21, %v677_v24  ;;  %v1245_v26 = vpop.f32.mrb[2].mxu1 }
 0x1e2   : > { %v1133_v27 = vmul.f32 -1.442695, %v686_v23  ;;  %v689_v28 = vadd.f32 %v1245_v26, %v1636_v21  ;;  %v680_v29 = vpop.f32.mrb[3].mxu1 }
 0x1e3   : > { %v1131_v30 = vmul.f32 -1.442695, %v678_v25  ;;  %v681_v31 = vadd.f32 %v1636_v21, %v680_v29 }
 0x1e4   : > { %1398 = vpow2.f32 %v1133_v27  ;;  %v1134_v32 = vmul.f32 -1.442695, %v689_v28 }
 0x1e5   : > { %1400 = vpow2.f32 %v1131_v30  ;;  %v1132_v33 = vmul.f32 -1.442695, %v681_v31 }
 0x1e6   : > { %1402 = vpow2.f32 %v1134_v32 }
 0x1e7   : > { %1404 = vpow2.f32 %v1132_v33  ;;  %v1248_v34 = vpop.f32.mrb[4].mxu1 }
 0x1e8   : > { %v702_v35 = vadd.f32 %v1248_v34, %v1636_v21  ;;  %v693_v37 = vpop.f32.mrb[5].mxu1 }
 0x1e9   : > { %v694_v38 = vadd.f32 %v1636_v21, %v693_v37  ;;  %v1249_v39 = vpop.f32.mrb[6].mxu1 }
 0x1ea   : > { %v1137_v40 = vmul.f32 -1.442695, %v702_v35  ;;  %v705_v41 = vadd.f32 %v1249_v39, %v1636_v21  ;;  %v696_v42 = vpop.f32.mrb[7].mxu1 }
 0x1eb   : > { %v1135_v43 = vmul.f32 -1.442695, %v694_v38  ;;  %v697_v44 = vadd.f32 %v1636_v21, %v696_v42 }
 0x1ec   : > { %1406 = vpow2.f32 %v1137_v40  ;;  %v1138_v45 = vmul.f32 -1.442695, %v705_v41 }
 0x1ed   : > { %1408 = vpow2.f32 %v1135_v43  ;;  %v1136_v46 = vmul.f32 -1.442695, %v697_v44 }
 0x1ee   : > { %v1399_v47 = vpop.eup %1398  ;;  %1410 = vpow2.f32 %v1138_v45 }
 0x1ef   : > { %v1401_v48 = vpop.eup %1400  ;;  %v790_v49 = vadd.f32 1.0, %v1399_v47  ;;  %1412 = vpow2.f32 %v1136_v46 }
 0x1f0   : > { %v1403_v36 = vpop.eup %1402  ;;  %v788_v50 = vadd.f32 1.0, %v1401_v48  ;;  %v1252_v51 = vpop.f32.mrb[8].mxu1 }
 0x1f1   : > { %v1405_v52 = vpop.eup %1404  ;;  %1414 = vrcp.f32 %v790_v49  ;;  %v791_v53 = vadd.f32 1.0, %v1403_v36  ;;  %v718_v54 = vadd.f32 %v1252_v51, %v1636_v21  ;;  %v709_v55 = vpop.f32.mrb[9].mxu1 }
 0x1f2   : > { %1416 = vrcp.f32 %v788_v50  ;;  %v789_v56 = vadd.f32 1.0, %v1405_v52  ;;  %v710_v57 = vadd.f32 %v1636_v21, %v709_v55  ;;  %v1253_v58 = vpop.f32.mrb[10].mxu1 }
 0x1f3   : > { %1418 = vrcp.f32 %v791_v53  ;;  %v1141_v59 = vmul.f32 -1.442695, %v718_v54  ;;  %v721_v60 = vadd.f32 %v1253_v58, %v1636_v21  ;;  %v712_v61 = vpop.f32.mrb[11].mxu1 }
 0x1f4   : > { %1420 = vrcp.f32 %v789_v56  ;;  %v1139_v62 = vmul.f32 -1.442695, %v710_v57  ;;  %v713_v63 = vadd.f32 %v1636_v21, %v712_v61 }
 0x1f5   : > { %1422 = vpow2.f32 %v1141_v59  ;;  %v1142_v0 = vmul.f32 -1.442695, %v721_v60 }
 0x1f6   : > { %v1407_v1 = vpop.eup %1406  ;;  %1424 = vpow2.f32 %v1139_v62  ;;  %v1140_v2 = vmul.f32 -1.442695, %v713_v63  ;;  %v1147_v62 = vld [vmem:[%s1705_s6] ss:$0 sm:$0xff] }
 0x1f7   : > { %v1409_v3 = vpop.eup %1408  ;;  %v794_v4 = vadd.f32 1.0, %v1407_v1  ;;  %1426 = vpow2.f32 %v1142_v0 }
 0x1f8   : > { %v1411_v5 = vpop.eup %1410  ;;  %v792_v6 = vadd.f32 1.0, %v1409_v3  ;;  %1428 = vpow2.f32 %v1140_v2  ;;  %v1256_v7 = vpop.f32.mrb[12].mxu1 }
 0x1f9   : > { %v1413_v8 = vpop.eup %1412  ;;  %1430 = vrcp.f32 %v794_v4  ;;  %v795_v9 = vadd.f32 1.0, %v1411_v5  ;;  %v734_v10 = vadd.f32 %v1256_v7, %v1636_v21  ;;  %v725_v11 = vpop.f32.mrb[13].mxu1 }
 0x1fa   : > { %1432 = vrcp.f32 %v792_v6  ;;  %v793_v12 = vadd.f32 1.0, %v1413_v8  ;;  %v726_v13 = vadd.f32 %v1636_v21, %v725_v11  ;;  %v1257_v14 = vpop.f32.mrb[14].mxu1 }
 0x1fb   : > { %v1415_v15 = vpop.eup %1414  ;;  %1434 = vrcp.f32 %v795_v9  ;;  %v1145_v16 = vmul.f32 -1.442695, %v734_v10  ;;  %v737_v17 = vadd.f32 %v1257_v14, %v1636_v21  ;;  %v728_v18 = vpop.f32.mrb[15].mxu1 }
 0x1fc   : > { %v1417_v19 = vpop.eup %1416  ;;  %1436 = vrcp.f32 %v793_v12  ;;  %v1143_v20 = vmul.f32 -1.442695, %v726_v13  ;;  %v729_v22 = vadd.f32 %v1636_v21, %v728_v18 }
 0x1fd   : > { %v1419_v23 = vpop.eup %1418  ;;  %1438 = vpow2.f32 %v1145_v16  ;;  %v1146_v24 = vmul.f32 -1.442695, %v737_v17 }
 0x1fe   : > { %v1421_v25 = vpop.eup %1420  ;;  %1440 = vpow2.f32 %v1143_v20  ;;  %v1144_v26 = vmul.f32 -1.442695, %v729_v22  ;;  %v837_v27 = vpack.c.bf16 %v1419_v23, %v1415_v15 }
 0x1ff   : > { %v1423_v28 = vpop.eup %1422  ;;  %1442 = vpow2.f32 %v1146_v24  ;;  %v836_v29 = vpack.c.bf16 %v1421_v25, %v1417_v19 }
 0x200   : > { %v1425_v30 = vpop.eup %1424  ;;  %v798_v31 = vadd.f32 1.0, %v1423_v28  ;;  %1444 = vpow2.f32 %v1144_v26 }
 0x201   : > { %v1427_v32 = vpop.eup %1426  ;;  %v796_v33 = vadd.f32 1.0, %v1425_v30  ;;  %1274 = vmatprep.mubr.bf16.mxu0 %v836_v29 }
 0x202   : > { %v1429_v34 = vpop.eup %1428  ;;  %1446 = vrcp.f32 %v798_v31  ;;  %v799_v35 = vadd.f32 1.0, %v1427_v32  ;;  %1275 = vmatmul.mubr.bf16.vlgmr.msra.gmra.mrb[16].mxu0 %v837_v27 }
 0x203   : > { %v1431_v21 = vpop.eup %1430  ;;  %1448 = vrcp.f32 %v796_v33  ;;  %v797_v37 = vadd.f32 1.0, %v1429_v34 }
 0x204   : > { %v1433_v38 = vpop.eup %1432  ;;  %1450 = vrcp.f32 %v799_v35 }
 0x205   : > { %v1435_v39 = vpop.eup %1434  ;;  %1452 = vrcp.f32 %v797_v37 }
 0x206   : > { %v1437_v40 = vpop.eup %1436  ;;  %v839_v41 = vpack.c.bf16 %v1435_v39, %v1431_v21 }
 0x207   : > { %v1439_v42 = vpop.eup %1438  ;;  %v838_v43 = vpack.c.bf16 %v1437_v40, %v1433_v38 }
 0x208   : > { %v1441_v44 = vpop.eup %1440  ;;  %v802_v45 = vadd.f32 1.0, %v1439_v42 }
 0x209   : > { %v1443_v46 = vpop.eup %1442  ;;  %v800_v47 = vadd.f32 1.0, %v1441_v44  ;;  %1278 = vmatprep.mubr.bf16.mxu0 %v838_v43 }
 0x20a   : > { %v1445_v48 = vpop.eup %1444  ;;  %1454 = vrcp.f32 %v802_v45  ;;  %v803_v49 = vadd.f32 1.0, %v1443_v46  ;;  %1279 = vmatmul.mubr.bf16.gmra.mrb[20].mxu0 %v839_v41 }
 0x20b   : > { %1456 = vrcp.f32 %v800_v47  ;;  %v801_v36 = vadd.f32 1.0, %v1445_v48 }
 0x20c   : > { %v1447_v50 = vpop.eup %1446  ;;  %1458 = vrcp.f32 %v803_v49 }
 0x20d   : > { %v1449_v51 = vpop.eup %1448  ;;  %1460 = vrcp.f32 %v801_v36 }
 0x20e   : > { %v1451_v52 = vpop.eup %1450 }
 0x20f   : > { %v1453_v53 = vpop.eup %1452  ;;  %v841_v54 = vpack.c.bf16 %v1451_v52, %v1447_v50 }
 0x210   : > { %v840_v55 = vpack.c.bf16 %v1453_v53, %v1449_v51 }
 0x212   : > { %1282 = vmatprep.mubr.bf16.mxu0 %v840_v55 }
 0x213   : > { %1283 = vmatmul.mubr.bf16.gmra.mrb[24].mxu0 %v841_v54 }
 0x214   : > { %v1455_v56 = vpop.eup %1454 }
 0x215   : > { %v1457_v57 = vpop.eup %1456 }
 0x216   : > { %v1459_v58 = vpop.eup %1458 }
 0x217   : > { %v1461_v59 = vpop.eup %1460  ;;  %v843_v60 = vpack.c.bf16 %v1459_v58, %v1455_v56 }
 0x218   : > { %v842_v61 = vpack.c.bf16 %v1461_v59, %v1457_v57 }
 0x21a   : > { %1286 = vmatprep.mubr.bf16.mxu1 %v842_v61 }
 0x21b   : > { %1287 = vmatmul.mubr.bf16.vlgmr.msra.gmra.mrb[16].mxu1 %v843_v60 }
 0x2d5   : > { %v1276_v63 = vpop.f32.mrb[16].mxu0 }
 0x2d6   : > { %v958_v0 = vadd.f32 %v1276_v63, %v1147_v62  ;;  %v949_v1 = vpop.f32.mrb[17].mxu0 }
 0x2d7   : > { %v950_v2 = vadd.f32 %v1147_v62, %v949_v1  ;;  %v1277_v3 = vpop.f32.mrb[18].mxu0 }
 0x2d8   : > { %1014 = vst.msk [vmem:[%s1662_s16 + $0x10] sm:$0xff] %vm346_vm0, %v958_v0  ;;  %v961_v4 = vadd.f32 %v1277_v3, %v1147_v62  ;;  %v952_v5 = vpop.f32.mrb[19].mxu0 }
 0x2d9   : > { %1012 = vst.msk [vmem:[%s1662_s16] sm:$0xff] %vm346_vm0, %v950_v2  ;;  %v953_v6 = vadd.f32 %v1147_v62, %v952_v5 }
 0x2da   : > { %1015 = vst.msk [vmem:[%s1662_s16 + $0x18] sm:$0xff] %vm346_vm0, %v961_v4 }
 0x2db   : > { %1013 = vst.msk [vmem:[%s1662_s16 + $0x8] sm:$0xff] %vm346_vm0, %v953_v6 }
 0x2dd   : > { %v1280_v7 = vpop.f32.mrb[20].mxu0 }
 0x2de   : > { %v974_v8 = vadd.f32 %v1280_v7, %v1147_v62  ;;  %v965_v9 = vpop.f32.mrb[21].mxu0 }
 0x2df   : > { %v966_v10 = vadd.f32 %v1147_v62, %v965_v9  ;;  %v1281_v11 = vpop.f32.mrb[22].mxu0 }
 0x2e0   : > { %1018 = vst.msk [vmem:[%s1662_s16 + $0x30] sm:$0xff] %vm346_vm0, %v974_v8  ;;  %v977_v12 = vadd.f32 %v1281_v11, %v1147_v62  ;;  %v968_v13 = vpop.f32.mrb[23].mxu0 }
 0x2e1   : > { %1016 = vst.msk [vmem:[%s1662_s16 + $0x20] sm:$0xff] %vm346_vm0, %v966_v10  ;;  %v969_v14 = vadd.f32 %v1147_v62, %v968_v13 }
 0x2e2   : > { %1019 = vst.msk [vmem:[%s1662_s16 + $0x38] sm:$0xff] %vm346_vm0, %v977_v12 }
 0x2e3   : > { %1017 = vst.msk [vmem:[%s1662_s16 + $0x28] sm:$0xff] %vm346_vm0, %v969_v14 }
 0x2e6   : > { %v1284_v15 = vpop.f32.mrb[24].mxu0 }
 0x2e7   : > { %v990_v16 = vadd.f32 %v1284_v15, %v1147_v62  ;;  %v981_v17 = vpop.f32.mrb[25].mxu0 }
 0x2e8   : > { %v982_v18 = vadd.f32 %v1147_v62, %v981_v17  ;;  %v1285_v19 = vpop.f32.mrb[26].mxu0 }
 0x2e9   : > { %1022 = vst.msk [vmem:[%s1662_s16 + $0x50] sm:$0xff] %vm346_vm0, %v990_v16  ;;  %v993_v20 = vadd.f32 %v1285_v19, %v1147_v62  ;;  %v984_v22 = vpop.f32.mrb[27].mxu0 }
 0x2ea   : > { %1020 = vst.msk [vmem:[%s1662_s16 + $0x40] sm:$0xff] %vm346_vm0, %v982_v18  ;;  %v985_v23 = vadd.f32 %v1147_v62, %v984_v22 }
 0x2eb   : > { %1023 = vst.msk [vmem:[%s1662_s16 + $0x58] sm:$0xff] %vm346_vm0, %v993_v20 }
 0x2ec   : > { %1021 = vst.msk [vmem:[%s1662_s16 + $0x48] sm:$0xff] %vm346_vm0, %v985_v23 }
 0x2ee   : > { %v1288_v24 = vpop.f32.mrb[16].mxu1 }
 0x2ef   : > { %v1006_v25 = vadd.f32 %v1288_v24, %v1147_v62  ;;  %v997_v26 = vpop.f32.mrb[17].mxu1 }
 0x2f0   : > { %v998_v27 = vadd.f32 %v1147_v62, %v997_v26  ;;  %v1289_v28 = vpop.f32.mrb[18].mxu1 }
 0x2f1   : > { %1026 = vst.msk [vmem:[%s1662_s16 + $0x70] sm:$0xff] %vm346_vm0, %v1006_v25  ;;  %v1009_v29 = vadd.f32 %v1289_v28, %v1147_v62  ;;  %v1000_v30 = vpop.f32.mrb[19].mxu1 }
 0x2f2   : > { %1024 = vst.msk [vmem:[%s1662_s16 + $0x60] sm:$0xff] %vm346_vm0, %v998_v27  ;;  %v1001_v31 = vadd.f32 %v1147_v62, %v1000_v30 }
 0x2f3   : > { %1027 = vst.msk [vmem:[%s1662_s16 + $0x78] sm:$0xff] %vm346_vm0, %v1009_v29 }
 0x2f4   : > { %1025 = vst.msk [vmem:[%s1662_s16 + $0x68] sm:$0xff] %vm346_vm0, %v1001_v31 }
 0x2f5 PF: > { %s17_s24 = sadd.s32 1, %s1468_s24  }
 0x2f6   : > { %p14_p4 = scmp.ge.s32.totalorder %s17_s24, 6  }
 0x2f8   :  { %16 = sbr.rel (!%p14_p4) target bundleno = 1 (0x1), region = 78 }

</bundles_post_ra>
